<compile_context>
chip_gen: v7x
topology: tpu7x:2x2x1
jax: 0.10.0
libtpu: 0.0.40
codegen_flags: <defaults>
</compile_context>

<pallas_src>
import jax
import jax.numpy as jnp
import numpy as np
from jax.experimental import pallas as pl
from jax.experimental.pallas import tpu as pltpu


def _matmul_bias_kernel(p_ref, w_ref, b_ref, o_ref):
    """One grid step: (TM, K) @ (K, CPAD) + bias -> (TM, CPAD), f32 accumulate."""
    acc = jnp.dot(p_ref[...], w_ref[...], preferred_element_type=jnp.float32)
    o_ref[...] = (acc + b_ref[...]).astype(o_ref.dtype)


def conv2d_pallas(x_nchw, weight_oihw, bias, *, tm=256):
    """nn.Conv2d forward (stride 1, VALID padding) via a Pallas TPU matmul kernel.

    x_nchw:      (N, Cin, H, W)       float32
    weight_oihw: (Cout, Cin, KH, KW)  float32  (PyTorch layout)
    bias:        (Cout,)              float32
    returns:     (N, Cout, OH, OW)    float32, OH = H-KH+1, OW = W-KW+1
    """
    n, cin, h, w = x_nchw.shape
    cout, cin_w, kh, kw = weight_oihw.shape
    assert cin == cin_w
    oh, ow = h - kh + 1, w - kw + 1

    k_dim = kh * kw * cin                      # contraction dim (taps fused)
    m = n * oh * ow                            # batch+spatial folded into M
    m_pad = ((m + tm - 1) // tm) * tm          # pad M to a TM multiple
    cpad = ((cout + 127) // 128) * 128         # lane-dense output width

    # ---- layout plumbing only (zero FLOPs) --------------------------------
    x_nhwc = jnp.transpose(x_nchw, (0, 2, 3, 1))            # (N, H, W, Cin)
    # im2col: column order (tap_i, tap_j, cin) matches the weight reshape below.
    cols = [x_nhwc[:, i:i + oh, j:j + ow, :]
            for i in range(kh) for j in range(kw)]
    patches = jnp.concatenate(cols, axis=-1).reshape(m, k_dim)
    patches = jnp.pad(patches, ((0, m_pad - m), (0, 0)))

    w_mat = jnp.transpose(weight_oihw, (2, 3, 1, 0)).reshape(k_dim, cout)
    w_mat = jnp.pad(w_mat, ((0, 0), (0, cpad - cout)))      # (K, CPAD)
    b_mat = jnp.pad(bias, (0, cpad - cout)).reshape(1, cpad)

    grid = (m_pad // tm,)
    cost = pl.CostEstimate(
        flops=2 * m * k_dim * cout,
        transcendentals=0,
        bytes_accessed=4 * (x_nchw.size + weight_oihw.size + bias.size
                            + m * cout))

    out = pl.pallas_call(
        _matmul_bias_kernel,
        out_shape=jax.ShapeDtypeStruct((m_pad, cpad), x_nchw.dtype),
        grid=grid,
        in_specs=[
            pl.BlockSpec((tm, k_dim), lambda i: (i, 0)),     # patch rows
            pl.BlockSpec((k_dim, cpad), lambda i: (0, 0)),   # weights (resident)
            pl.BlockSpec((1, cpad), lambda i: (0, 0)),       # bias (resident)
        ],
        out_specs=pl.BlockSpec((tm, cpad), lambda i: (i, 0)),
        compiler_params=pltpu.CompilerParams(
            dimension_semantics=("parallel",)),
        cost_estimate=cost,
    )(patches, w_mat, b_mat)

    out = out[:m, :cout].reshape(n, oh, ow, cout)
    return jnp.transpose(out, (0, 3, 1, 2))                  # back to NCHW


if __name__ == "__main__":
    # Module config (small, consistent with Conv(in_chanels, out_chanels, k)).
    N, CIN, H, W = 2, 4, 16, 16
    COUT, K = 8, 3

    key = jax.random.PRNGKey(0)
    kx, kw_, kb = jax.random.split(key, 3)

    x = jax.random.normal(kx, (N, CIN, H, W), dtype=jnp.float32)
    # Deterministic synthetic parameters (PyTorch Conv2d init ranges).
    fan_in = CIN * K * K
    bound = 1.0 / np.sqrt(fan_in)
    weight = jax.random.uniform(kw_, (COUT, CIN, K, K),
                                minval=-bound, maxval=bound,
                                dtype=jnp.float32)
    bias = jax.random.uniform(kb, (COUT,), minval=-bound, maxval=bound,
                              dtype=jnp.float32)

    out = jax.jit(conv2d_pallas)(x, weight, bias)
    out = jax.block_until_ready(out)

    # Cross-check against XLA's reference conv (same semantics as nn.Conv2d).
    ref = jax.lax.conv_general_dilated(
        x, weight, window_strides=(1, 1), padding="VALID",
        dimension_numbers=("NCHW", "OIHW", "NCHW"))
    ref = ref + bias.reshape(1, COUT, 1, 1)
    np.testing.assert_allclose(np.asarray(out), np.asarray(ref),
                               rtol=1e-4, atol=1e-5)
    assert out.shape == (N, COUT, H - K + 1, W - K + 1)

    # TODO(synk): the backward gradient-printing hook (register_hook/get_hook)
    # affects only the backward pass and is intentionally not reproduced.
    print("KERNEL_OK")
</pallas_src>

<mosaic_0001>
module attributes {stable_mosaic.version = 11 : i64} {
  func.func @_matmul_bias_kernel(%arg0: i32, %arg1: memref<256x36xf32, #tpu.memory_space<vmem>>, %arg2: memref<36x128xf32, #tpu.memory_space<vmem>>, %arg3: memref<1x128xf32, #tpu.memory_space<vmem>>, %arg4: memref<256x128xf32, #tpu.memory_space<vmem>>) attributes {dimension_semantics = [#tpu.dimension_semantics<parallel>], iteration_bounds = array<i64: 2>, scalar_prefetch = 0 : i64, scratch_operands = 0 : i64, tpu.core_type = #tpu.core_type<tc>, window_params = [{transform_indices = @transform_0, window_bounds = array<i64: 256, 36>}, {pipeline_mode = #tpu.pipeline_mode<synchronous>, transform_indices = @transform_1, window_bounds = array<i64: 36, 128>}, {pipeline_mode = #tpu.pipeline_mode<synchronous>, transform_indices = @transform_2, window_bounds = array<i64: 1, 128>}, {transform_indices = @transform_3, window_bounds = array<i64: 256, 128>}]} {
    %c0 = arith.constant 0 : index
    %c0_0 = arith.constant 0 : index
    %0 = vector.load %arg1[%c0, %c0_0] : memref<256x36xf32, #tpu.memory_space<vmem>>, vector<256x36xf32>
    %c0_1 = arith.constant 0 : index
    %c0_2 = arith.constant 0 : index
    %1 = vector.load %arg2[%c0_1, %c0_2] : memref<36x128xf32, #tpu.memory_space<vmem>>, vector<36x128xf32>
    %cst = arith.constant dense<0.000000e+00> : vector<256x128xf32>
    %2 = tpu.matmul %0, %1, %cst {dimension_numbers = #tpu.dot_dimension_numbers<[1], [0], [0], [1], [0, 0, 1, 1], [], []>} : vector<256x36xf32>, vector<36x128xf32>, vector<256x128xf32> -> vector<256x128xf32>
    %c0_3 = arith.constant 0 : index
    %c0_4 = arith.constant 0 : index
    %3 = vector.load %arg3[%c0_3, %c0_4] : memref<1x128xf32, #tpu.memory_space<vmem>>, vector<1x128xf32>
    %4 = vector.broadcast %3 : vector<1x128xf32> to vector<256x128xf32>
    %5 = arith.addf %2, %4 : vector<256x128xf32>
    %c0_5 = arith.constant 0 : index
    %c0_6 = arith.constant 0 : index
    %6 = vector.load %arg4[%c0_5, %c0_6] : memref<256x128xf32, #tpu.memory_space<vmem>>, vector<256x128xf32>
    tpu.vector_store %arg4[%c0_5, %c0_6], %5 {strides = array<i32>} : memref<256x128xf32, #tpu.memory_space<vmem>>, vector<256x128xf32>,
    return
  }
  func.func @transform_0(%arg0: i32) -> (i32, i32) {
    %c0_i32 = arith.constant 0 : i32
    %c0_i32_0 = arith.constant 0 : i32
    return %arg0, %c0_i32 : i32, i32
  }
  func.func @transform_1(%arg0: i32) -> (i32, i32) {
    %c0_i32 = arith.constant 0 : i32
    %c0_i32_0 = arith.constant 0 : i32
    %c0_i32_1 = arith.constant 0 : i32
    return %c0_i32, %c0_i32_0 : i32, i32
  }
  func.func @transform_2(%arg0: i32) -> (i32, i32) {
    %c0_i32 = arith.constant 0 : i32
    %c0_i32_0 = arith.constant 0 : i32
    %c0_i32_1 = arith.constant 0 : i32
    return %c0_i32, %c0_i32_0 : i32, i32
  }
  func.func @transform_3(%arg0: i32) -> (i32, i32) {
    %c0_i32 = arith.constant 0 : i32
    %c0_i32_0 = arith.constant 0 : i32
    return %arg0, %c0_i32 : i32, i32
  }
}

</mosaic_0001>

<bundles_post_ra>
// kernel: conv2d_pallas.1
= control target key start
LH: loop header
LB: loop body
LE: loop exit
PB: predicated region body
PF: predicated region fallthrough
CT: control target
= control target key end

     0   :  { %s822_s12 = smov 0   ;;  %s1002_s0 = inlined_call_operand.vmem [shape: f32[512,36], index: 0, kind: input, shape index: {}]   ;;  %s1003_s1 = inlined_call_operand.vmem [shape: f32[36,128], index: 1, kind: input, shape index: {}]   ;;  %s1004_s2 = inlined_call_operand.vmem [shape: f32[1,128], index: 2, kind: input, shape index: {}]   ;;  %s1005_s3 = inlined_call_operand.vmem [shape: f32[512,128], index: 3, kind: output, shape index: {}]  }
   0x1 LB: > { %s632_s13 = sadd.s32 4294967295, %s800_s12   ;;  %p636_p0 = scmp.ge.s32.totalorder %s800_s12, 1  ;;  %s800_s12 = sphi %s822_s12, %s13_s12  }
   0x2   : > { %p138_p1 = scmp.lt.s32.totalorder %s800_s12, 3 }
   0x4   : > { %p139_p2 = pnand %p636_p0, %p138_p1 }
   0x5   : > { %v206_v0 = vld [vmem:[%s1003_s1] sm:$0xff] (!%p139_p2)  ;;  %v207_v1 = vld [vmem:[%s1003_s1 + $0x8] sm:$0xff] (!%p139_p2)  ;;  %v208_v2 = vld [vmem:[%s1003_s1 + $0x10] sm:$0xff] (!%p139_p2)  ;;  %s637_s20 = sshll.u32 (!%p139_p2), %s632_s13, 5  ;;  %vm315_vm0 = vcmask (!%p139_p2), 1043456   ;;  %vm218_vm1 = vcmask (!%p139_p2), 293888  }
   0x6   : > { %142 = sbr.rel (%p139_p2) target bundleno = 263 (0x107), region = 32  ;;  %v772_v3 = vpack.c.bf16 (!%p139_p2), %v207_v1, %v206_v0  ;;  %v209_v4 = vld [vmem:[%s1003_s1 + $0x18] sm:$0xff] (!%p139_p2)  ;;  %p163_p3 = scmp.lt.s32.totalorder (!%p139_p2), %s637_s20, 63  ;;  %v210_v6 = vld [vmem:[%s1003_s1 + $0x20] sm:$0xf] (!%p139_p2) }
   0x7   : > { %v776_v5 = vpack.c.bf16 (!%p139_p2), %v209_v4, %v208_v2  ;;  %v926_v39 = vld [vmem:[%s1004_s2] ss:$0 sm:$0xff] (!%p139_p2) }
   0x8   : > { %773 = vmatprep.subr.bf16.mxu0 (!%p139_p2), %v772_v3  ;;  %780 = vmatprep.subr.bf16.mxu1 (!%p139_p2), %v772_v3 }
   0x9   : > { %775 = vmatpush3.bf16.msra.mxu0 (!%p139_p2), %v772_v3  ;;  %783 = vmatpush3.bf16.msra.mxu1 (!%p139_p2), %v772_v3 }
   0xa   : > { %777 = vmatprep.subr.bf16.mxu0 (!%p139_p2), %v776_v5  ;;  %781 = vmatprep.subr.bf16.mxu1 (!%p139_p2), %v776_v5 }
   0xd   : > { %s1007_s20 = smov (!%p163_p3, %s637_s20), 63  ;;  %779 = vmatpush3.bf16.msra.mxu0 %v776_v5  ;;  %784 = vmatpush3.bf16.msra.mxu1 %v776_v5 }
   0xe   : > { %s638_s23 = sshll.u32 %s1007_s20, 3  ;;  %722 = vmatprep.subr.msk.mxu0 %vm315_vm0, %v210_v6  ;;  %782 = vmatprep.subr.msk.mxu1 %vm315_vm0, %v210_v6 }
   0xf   : > { %s853_s28 = scalar_lea.vmem %s1002_s0, %s638_s23  ;;  %s933_s6 = scalar_lea.vmem %s1005_s3, %s638_s23 }
  0x10   : > { %v174_v7 = vld [vmem:[%s853_s28] sm:$0xff]  ;;  %v175_v9 = vld [vmem:[%s853_s28 + $0x8] sm:$0xff]  ;;  %v176_v11 = vld [vmem:[%s853_s28 + $0x10] sm:$0xff] }
  0x11   : > { %v190_v8 = vld [vmem:[%s853_s28 + $0x80] sm:$0xff]  ;;  %724 = vmatprep.mubr.msk.f32.mxu0 %vm218_vm1, %v174_v7  ;;  %v191_v10 = vld [vmem:[%s853_s28 + $0x88] sm:$0xff]  ;;  %v192_v12 = vld [vmem:[%s853_s28 + $0x90] sm:$0xff]  ;;  %723 = vmatpush3.msk.msra.mxu0 %vm315_vm0, %v210_v6 }
  0x12   : > { %748 = vmatprep.mubr.msk.f32.mxu1 %vm218_vm1, %v190_v8  ;;  %785 = vmatpush3.msk.msra.mxu1 %vm315_vm0, %v210_v6  ;;  %v177_v13 = vld [vmem:[%s853_s28 + $0x18] sm:$0xff]  ;;  %v178_v15 = vld [vmem:[%s853_s28 + $0x20] sm:$0xff]  ;;  %v179_v17 = vld [vmem:[%s853_s28 + $0x28] sm:$0xff] }
  0x13   : > { %725 = vmatmul.mubr.msk.f32.vlgmr.msra.gmra.mrb[0].mxu0 %vm218_vm1, %v175_v9  ;;  %749 = vmatmul.mubr.msk.f32.vlgmr.msra.gmra.mrb[0].mxu1 %vm218_vm1, %v191_v10  ;;  %v193_v14 = vld [vmem:[%s853_s28 + $0x98] sm:$0xff]  ;;  %v194_v16 = vld [vmem:[%s853_s28 + $0xa0] sm:$0xff]  ;;  %v195_v18 = vld [vmem:[%s853_s28 + $0xa8] sm:$0xff] }
  0x14   : > { %727 = vmatprep.mubr.msk.f32.mxu0 %vm218_vm1, %v176_v11  ;;  %751 = vmatprep.mubr.msk.f32.mxu1 %vm218_vm1, %v192_v12  ;;  %v180_v19 = vld [vmem:[%s853_s28 + $0x30] sm:$0xff]  ;;  %v181_v21 = vld [vmem:[%s853_s28 + $0x38] sm:$0xff]  ;;  %v182_v23 = vld [vmem:[%s853_s28 + $0x40] sm:$0xff] }
  0x15   : > { %v196_v20 = vld [vmem:[%s853_s28 + $0xb0] sm:$0xff]  ;;  %v197_v22 = vld [vmem:[%s853_s28 + $0xb8] sm:$0xff]  ;;  %v198_v24 = vld [vmem:[%s853_s28 + $0xc0] sm:$0xff] }
  0x16   : > { %v183_v25 = vld [vmem:[%s853_s28 + $0x48] sm:$0xff]  ;;  %v184_v27 = vld [vmem:[%s853_s28 + $0x50] sm:$0xff]  ;;  %v185_v29 = vld [vmem:[%s853_s28 + $0x58] sm:$0xff] }
  0x17   : > { %728 = vmatmul.mubr.msk.f32.gmra.mrb[2].mxu0 %vm218_vm1, %v177_v13  ;;  %752 = vmatmul.mubr.msk.f32.gmra.mrb[2].mxu1 %vm218_vm1, %v193_v14  ;;  %v199_v26 = vld [vmem:[%s853_s28 + $0xc8] sm:$0xff]  ;;  %v200_v28 = vld [vmem:[%s853_s28 + $0xd0] sm:$0xff]  ;;  %v201_v30 = vld [vmem:[%s853_s28 + $0xd8] sm:$0xff] }
  0x18   : > { %730 = vmatprep.mubr.msk.f32.mxu0 %vm218_vm1, %v178_v15  ;;  %754 = vmatprep.mubr.msk.f32.mxu1 %vm218_vm1, %v194_v16  ;;  %v186_v31 = vld [vmem:[%s853_s28 + $0x60] sm:$0xff]  ;;  %v187_v33 = vld [vmem:[%s853_s28 + $0x68] sm:$0xff]  ;;  %v188_v35 = vld [vmem:[%s853_s28 + $0x70] sm:$0xff] }
  0x19   : > { %v202_v32 = vld [vmem:[%s853_s28 + $0xe0] sm:$0xff]  ;;  %v203_v34 = vld [vmem:[%s853_s28 + $0xe8] sm:$0xff]  ;;  %v204_v36 = vld [vmem:[%s853_s28 + $0xf0] sm:$0xff] }
  0x1a   : > { %v189_v37 = vld [vmem:[%s853_s28 + $0x78] sm:$0xff] }
  0x1b   : > { %731 = vmatmul.mubr.msk.f32.gmra.mrb[4].mxu0 %vm218_vm1, %v179_v17  ;;  %755 = vmatmul.mubr.msk.f32.gmra.mrb[4].mxu1 %vm218_vm1, %v195_v18  ;;  %v205_v38 = vld [vmem:[%s853_s28 + $0xf8] sm:$0xff] }
  0x1c   : > { %733 = vmatprep.mubr.msk.f32.mxu0 %vm218_vm1, %v180_v19  ;;  %757 = vmatprep.mubr.msk.f32.mxu1 %vm218_vm1, %v196_v20 }
  0x1f   : > { %734 = vmatmul.mubr.msk.f32.gmra.mrb[6].mxu0 %vm218_vm1, %v181_v21  ;;  %758 = vmatmul.mubr.msk.f32.gmra.mrb[6].mxu1 %vm218_vm1, %v197_v22 }
  0x20   : > { %736 = vmatprep.mubr.msk.f32.mxu0 %vm218_vm1, %v182_v23  ;;  %760 = vmatprep.mubr.msk.f32.mxu1 %vm218_vm1, %v198_v24 }
  0x23   : > { %737 = vmatmul.mubr.msk.f32.gmra.mrb[8].mxu0 %vm218_vm1, %v183_v25  ;;  %761 = vmatmul.mubr.msk.f32.gmra.mrb[8].mxu1 %vm218_vm1, %v199_v26 }
  0x24   : > { %739 = vmatprep.mubr.msk.f32.mxu0 %vm218_vm1, %v184_v27  ;;  %763 = vmatprep.mubr.msk.f32.mxu1 %vm218_vm1, %v200_v28 }
  0x27   : > { %740 = vmatmul.mubr.msk.f32.gmra.mrb[10].mxu0 %vm218_vm1, %v185_v29  ;;  %764 = vmatmul.mubr.msk.f32.gmra.mrb[10].mxu1 %vm218_vm1, %v201_v30 }
  0x28   : > { %742 = vmatprep.mubr.msk.f32.mxu0 %vm218_vm1, %v186_v31  ;;  %766 = vmatprep.mubr.msk.f32.mxu1 %vm218_vm1, %v202_v32 }
  0x2b   : > { %743 = vmatmul.mubr.msk.f32.gmra.mrb[12].mxu0 %vm218_vm1, %v187_v33  ;;  %767 = vmatmul.mubr.msk.f32.gmra.mrb[12].mxu1 %vm218_vm1, %v203_v34 }
  0x2c   : > { %745 = vmatprep.mubr.msk.f32.mxu0 %vm218_vm1, %v188_v35  ;;  %769 = vmatprep.mubr.msk.f32.mxu1 %vm218_vm1, %v204_v36 }
  0x2f   : > { %746 = vmatmul.mubr.msk.f32.gmra.mrb[14].mxu0 %vm218_vm1, %v189_v37  ;;  %770 = vmatmul.mubr.msk.f32.gmra.mrb[14].mxu1 %vm218_vm1, %v205_v38 }
  0xe6   : > { %v726_v40 = vpop.f32.mrb[0].mxu0  ;;  %v750_v41 = vpop.f32.mrb[0].mxu1 }
  0xe7   : > { %v391_v42 = vadd.f32 %v726_v40, %v926_v39  ;;  %v471_v43 = vadd.f32 %v750_v41, %v926_v39  ;;  %v385_v44 = vpop.f32.mrb[1].mxu0  ;;  %v465_v45 = vpop.f32.mrb[1].mxu1 }
  0xe8   : > { %v386_v46 = vadd.f32 %v926_v39, %v385_v44  ;;  %v466_v47 = vadd.f32 %v926_v39, %v465_v45 }
  0xe9   : > { %545 = vst [vmem:[%s933_s6 + $0x8] sm:$0xff] %v391_v42  ;;  %561 = vst [vmem:[%s933_s6 + $0x88] sm:$0xff] %v471_v43 }
  0xea   : > { %544 = vst [vmem:[%s933_s6] sm:$0xff] %v386_v46  ;;  %560 = vst [vmem:[%s933_s6 + $0x80] sm:$0xff] %v466_v47  ;;  %v729_v48 = vpop.f32.mrb[2].mxu0  ;;  %v753_v49 = vpop.f32.mrb[2].mxu1 }
  0xeb   : > { %v401_v50 = vadd.f32 %v729_v48, %v926_v39  ;;  %v481_v51 = vadd.f32 %v753_v49, %v926_v39  ;;  %v395_v52 = vpop.f32.mrb[3].mxu0  ;;  %v475_v53 = vpop.f32.mrb[3].mxu1 }
  0xec   : > { %v396_v54 = vadd.f32 %v926_v39, %v395_v52  ;;  %v476_v55 = vadd.f32 %v926_v39, %v475_v53 }
  0xed   : > { %547 = vst [vmem:[%s933_s6 + $0x18] sm:$0xff] %v401_v50  ;;  %563 = vst [vmem:[%s933_s6 + $0x98] sm:$0xff] %v481_v51 }
  0xee   : > { %546 = vst [vmem:[%s933_s6 + $0x10] sm:$0xff] %v396_v54  ;;  %562 = vst [vmem:[%s933_s6 + $0x90] sm:$0xff] %v476_v55  ;;  %v732_v56 = vpop.f32.mrb[4].mxu0  ;;  %v756_v57 = vpop.f32.mrb[4].mxu1 }
  0xef   : > { %v411_v58 = vadd.f32 %v732_v56, %v926_v39  ;;  %v491_v59 = vadd.f32 %v756_v57, %v926_v39  ;;  %v405_v60 = vpop.f32.mrb[5].mxu0  ;;  %v485_v61 = vpop.f32.mrb[5].mxu1 }
  0xf0   : > { %v406_v62 = vadd.f32 %v926_v39, %v405_v60  ;;  %v486_v63 = vadd.f32 %v926_v39, %v485_v61 }
  0xf1   : > { %549 = vst [vmem:[%s933_s6 + $0x28] sm:$0xff] %v411_v58  ;;  %565 = vst [vmem:[%s933_s6 + $0xa8] sm:$0xff] %v491_v59 }
  0xf2   : > { %548 = vst [vmem:[%s933_s6 + $0x20] sm:$0xff] %v406_v62  ;;  %564 = vst [vmem:[%s933_s6 + $0xa0] sm:$0xff] %v486_v63  ;;  %v735_v0 = vpop.f32.mrb[6].mxu0  ;;  %v759_v1 = vpop.f32.mrb[6].mxu1 }
  0xf3   : > { %v421_v2 = vadd.f32 %v735_v0, %v926_v39  ;;  %v501_v3 = vadd.f32 %v759_v1, %v926_v39  ;;  %v415_v4 = vpop.f32.mrb[7].mxu0  ;;  %v495_v5 = vpop.f32.mrb[7].mxu1 }
  0xf4   : > { %v416_v6 = vadd.f32 %v926_v39, %v415_v4  ;;  %v496_v7 = vadd.f32 %v926_v39, %v495_v5 }
  0xf5   : > { %551 = vst [vmem:[%s933_s6 + $0x38] sm:$0xff] %v421_v2  ;;  %567 = vst [vmem:[%s933_s6 + $0xb8] sm:$0xff] %v501_v3 }
  0xf6   : > { %550 = vst [vmem:[%s933_s6 + $0x30] sm:$0xff] %v416_v6  ;;  %566 = vst [vmem:[%s933_s6 + $0xb0] sm:$0xff] %v496_v7  ;;  %v738_v8 = vpop.f32.mrb[8].mxu0  ;;  %v762_v9 = vpop.f32.mrb[8].mxu1 }
  0xf7   : > { %v431_v10 = vadd.f32 %v738_v8, %v926_v39  ;;  %v511_v11 = vadd.f32 %v762_v9, %v926_v39  ;;  %v425_v12 = vpop.f32.mrb[9].mxu0  ;;  %v505_v13 = vpop.f32.mrb[9].mxu1 }
  0xf8   : > { %v426_v14 = vadd.f32 %v926_v39, %v425_v12  ;;  %v506_v15 = vadd.f32 %v926_v39, %v505_v13 }
  0xf9   : > { %553 = vst [vmem:[%s933_s6 + $0x48] sm:$0xff] %v431_v10  ;;  %569 = vst [vmem:[%s933_s6 + $0xc8] sm:$0xff] %v511_v11 }
  0xfa   : > { %552 = vst [vmem:[%s933_s6 + $0x40] sm:$0xff] %v426_v14  ;;  %568 = vst [vmem:[%s933_s6 + $0xc0] sm:$0xff] %v506_v15  ;;  %v741_v16 = vpop.f32.mrb[10].mxu0  ;;  %v765_v17 = vpop.f32.mrb[10].mxu1 }
  0xfb   : > { %v441_v18 = vadd.f32 %v741_v16, %v926_v39  ;;  %v521_v19 = vadd.f32 %v765_v17, %v926_v39  ;;  %v435_v20 = vpop.f32.mrb[11].mxu0  ;;  %v515_v21 = vpop.f32.mrb[11].mxu1 }
  0xfc   : > { %v436_v22 = vadd.f32 %v926_v39, %v435_v20  ;;  %v516_v23 = vadd.f32 %v926_v39, %v515_v21 }
  0xfd   : > { %555 = vst [vmem:[%s933_s6 + $0x58] sm:$0xff] %v441_v18  ;;  %571 = vst [vmem:[%s933_s6 + $0xd8] sm:$0xff] %v521_v19 }
  0xfe   : > { %554 = vst [vmem:[%s933_s6 + $0x50] sm:$0xff] %v436_v22  ;;  %570 = vst [vmem:[%s933_s6 + $0xd0] sm:$0xff] %v516_v23  ;;  %v744_v24 = vpop.f32.mrb[12].mxu0  ;;  %v768_v25 = vpop.f32.mrb[12].mxu1 }
  0xff   : > { %v451_v26 = vadd.f32 %v744_v24, %v926_v39  ;;  %v531_v27 = vadd.f32 %v768_v25, %v926_v39  ;;  %v445_v28 = vpop.f32.mrb[13].mxu0  ;;  %v525_v29 = vpop.f32.mrb[13].mxu1 }
 0x100   : > { %v446_v30 = vadd.f32 %v926_v39, %v445_v28  ;;  %v526_v31 = vadd.f32 %v926_v39, %v525_v29 }
 0x101   : > { %557 = vst [vmem:[%s933_s6 + $0x68] sm:$0xff] %v451_v26  ;;  %573 = vst [vmem:[%s933_s6 + $0xe8] sm:$0xff] %v531_v27 }
 0x102   : > { %556 = vst [vmem:[%s933_s6 + $0x60] sm:$0xff] %v446_v30  ;;  %572 = vst [vmem:[%s933_s6 + $0xe0] sm:$0xff] %v526_v31  ;;  %v747_v32 = vpop.f32.mrb[14].mxu0  ;;  %v771_v33 = vpop.f32.mrb[14].mxu1 }
 0x103   : > { %v461_v34 = vadd.f32 %v747_v32, %v926_v39  ;;  %v541_v35 = vadd.f32 %v771_v33, %v926_v39  ;;  %v455_v36 = vpop.f32.mrb[15].mxu0  ;;  %v535_v37 = vpop.f32.mrb[15].mxu1 }
 0x104   : > { %v456_v38 = vadd.f32 %v926_v39, %v455_v36  ;;  %v536_v40 = vadd.f32 %v926_v39, %v535_v37 }
 0x105   : > { %559 = vst [vmem:[%s933_s6 + $0x78] sm:$0xff] %v461_v34  ;;  %575 = vst [vmem:[%s933_s6 + $0xf8] sm:$0xff] %v541_v35 }
 0x106   : > { %558 = vst [vmem:[%s933_s6 + $0x70] sm:$0xff] %v456_v38  ;;  %574 = vst [vmem:[%s933_s6 + $0xf0] sm:$0xff] %v536_v40 }
 0x107 PF: > { %s13_s12 = sadd.s32 1, %s800_s12  }
 0x108   : > { %p10_p4 = scmp.ge.s32.totalorder %s13_s12, 4  }
 0x10a   :  { %12 = sbr.rel (!%p10_p4) target bundleno = 1 (0x1), region = 62 }

</bundles_post_ra>
